<compile_context>
chip_gen: v5e
topology: v5e:2x2
jax: 0.10.0
libtpu: 0.0.40
codegen_flags: <defaults>
</compile_context>

<pallas_src>
import functools

import jax
import jax.numpy as jnp
from jax.experimental import pallas as pl
from jax.experimental.pallas import tpu as pltpu


# --------------------------------------------------------------------------------
# Small helpers
# --------------------------------------------------------------------------------
def _cdiv(a, b):
    return (a + b - 1) // b


def _round_up(x, m):
    return _cdiv(x, m) * m


@functools.lru_cache(maxsize=None)
def _vmem_limit_bytes():
    """Scoped-VMEM limit: ~3/4 of physical VMEM, clamped to a safe range."""
    cap = 64 << 20  # conservative default (v7x physical VMEM per core)
    try:
        info = pltpu.get_tpu_info()
        c = getattr(info, "vmem_capacity_bytes", None)
        if c:
            cap = int(c)
    except Exception:
        pass
    limit = (cap * 3) // 4
    return max(32 << 20, min(limit, 98 << 20))


def _pick_tm(m, cap=512, align=16):
    """Row-tile for the fused kernel: aligned, <= cap, and >=2 grid steps when
    cheap to do so (feeds both TensorCores on v7x)."""
    mp = _round_up(max(m, 1), align)
    if mp <= cap:
        if mp >= 2 * align:
            tm = _round_up(_cdiv(mp, 2), align)
            return tm, _round_up(mp, tm)
        return mp, mp
    n = _cdiv(mp, cap)
    tm = _round_up(_cdiv(mp, n), align)
    return tm, n * tm


def _tile_and_pad(dim, cap, align):
    """(tile, padded_dim) for the tiled fallback.  Full dim if it fits the cap
    (always a legal block), otherwise aligned tiles + padding (no odd tiles)."""
    if dim <= cap:
        return dim, dim
    d = _round_up(dim, align)
    n = _cdiv(d, cap)
    t = _round_up(_cdiv(d, n), align)
    return t, n * t


# --------------------------------------------------------------------------------
# Parameter preparation (one-time, outside the per-call path).
# PyTorch nn.Linear stores W as (out, in); transpose to (in, out) at load time.
# --------------------------------------------------------------------------------
def prepare_params(params, mxu_dtype=jnp.bfloat16):
    """params: list of (W, b) with W in (in_dim, out_dim) layout, f32.
    Returns list of (W_bf16, b_f32_1xN) ready for the kernels."""
    prepped = []
    for w, b in params:
        prepped.append((w.astype(mxu_dtype), b.reshape(1, -1).astype(jnp.float32)))
    return prepped


# --------------------------------------------------------------------------------
# Fused-MLP kernel: all weights of the group resident in VMEM, grid over M only.
#   refs = (x_ref, w_0, b_0, w_1, b_1, ..., o_ref)
# --------------------------------------------------------------------------------
def _fused_mlp_kernel(*refs, n_layers, relu_flags, short_cut):
    x_ref = refs[0]
    o_ref = refs[-1]
    h = x_ref[...]
    for li in range(n_layers):
        w = refs[1 + 2 * li][...]
        b = refs[2 + 2 * li][...]
        lhs = h if h.dtype == w.dtype else h.astype(w.dtype)
        hid = jnp.dot(lhs, w, preferred_element_type=jnp.float32) + b
        if relu_flags[li]:
            hid = jnp.maximum(hid, 0.0)
        if short_cut and hid.shape == h.shape:
            hid = hid + h  # activation first, then short-cut (as in the module)
        h = hid
    o_ref[...] = h.astype(o_ref.dtype)


def fused_mlp_group(h, wbs, relu_flags, short_cut, out_dtype, tm_cap=512):
    """Run a group of adjacent Linear(+ReLU)(+residual) layers in one pallas_call.
    h: (M, D_in).  wbs: [(W_i (D_{i-1}, D_i) bf16, b_i (1, D_i) f32), ...]."""
    M, d_in = h.shape
    d_out = wbs[-1][0].shape[1]
    tm, mp = _pick_tm(M, tm_cap)
    if mp != M:
        h = jnp.pad(h, ((0, mp - M), (0, 0)))

    in_specs = [pl.BlockSpec((tm, d_in), lambda i: (i, 0))]
    args = [h]
    for w, b in wbs:
        in_specs.append(pl.BlockSpec(w.shape, lambda i: (0, 0)))   # resident weight
        in_specs.append(pl.BlockSpec(b.shape, lambda i: (0, 0)))   # resident bias
        args += [w, b]

    out = pl.pallas_call(
        functools.partial(_fused_mlp_kernel, n_layers=len(wbs),
                          relu_flags=tuple(relu_flags), short_cut=short_cut),
        grid=(mp // tm,),
        in_specs=in_specs,
        out_specs=pl.BlockSpec((tm, d_out), lambda i: (i, 0)),
        out_shape=jax.ShapeDtypeStruct((mp, d_out), out_dtype),
        compiler_params=pltpu.CompilerParams(
            dimension_semantics=("parallel",),
            vmem_limit_bytes=_vmem_limit_bytes(),
        ),
    )(*args)
    return out[:M] if mp != M else out


# --------------------------------------------------------------------------------
# Tiled per-layer fallback (used only when a layer's weights are too big to keep
# resident).  grid = (M/tm, N/tn[, K/tk]); K-reduction last, "arbitrary".
# --------------------------------------------------------------------------------
def _linear_kernel(*refs, apply_relu, has_residual, multi_k):
    if multi_k:
        acc_ref = refs[-1]
        refs = refs[:-1]
    o_ref = refs[-1]
    x_ref, w_ref, b_ref = refs[0], refs[1], refs[2]
    r_ref = refs[3] if has_residual else None

    lhs = x_ref[...]
    if lhs.dtype != w_ref.dtype:
        lhs = lhs.astype(w_ref.dtype)
    part = jnp.dot(lhs, w_ref[...], preferred_element_type=jnp.float32)

    def _epilogue(acc):
        h = acc + b_ref[...]
        if apply_relu:
            h = jnp.maximum(h, 0.0)
        if r_ref is not None:
            h = h + r_ref[...].astype(jnp.float32)
        o_ref[...] = h.astype(o_ref.dtype)

    if multi_k:
        k = pl.program_id(2)

        @pl.when(k == 0)
        def _():
            acc_ref[...] = jnp.zeros_like(acc_ref)

        acc_ref[...] += part

        @pl.when(k == pl.num_programs(2) - 1)
        def _():
            _epilogue(acc_ref[...])
    else:
        _epilogue(part)


def linear(x, w, b2d, *, apply_relu=False, residual=None, out_dtype=None,
           tm_cap=512, tn_cap=1024, tk_cap=512):
    """y = relu?(x @ w + b) (+ residual).  x:(M,K) w:(K,N) bf16, b2d:(1,N) f32."""
    M, K = x.shape
    Kw, N = w.shape
    assert K == Kw and b2d.shape == (1, N)
    out_dtype = out_dtype or x.dtype

    align_m = 16 if (jnp.dtype(out_dtype) == jnp.bfloat16
                     or x.dtype == jnp.bfloat16) else 8
    tm, mp = _tile_and_pad(M, tm_cap, align_m)
    tn, np_ = _tile_and_pad(N, tn_cap, 128)
    tk, kp = _tile_and_pad(K, tk_cap, 128)

    if mp != M or kp != K:
        x = jnp.pad(x, ((0, mp - M), (0, kp - K)))
    if kp != K or np_ != N:
        w = jnp.pad(w, ((0, kp - K), (0, np_ - N)))
    if np_ != N:
        b2d = jnp.pad(b2d, ((0, 0), (0, np_ - N)))
    if residual is not None and (mp != M or np_ != N):
        residual = jnp.pad(residual, ((0, mp - M), (0, np_ - N)))

    nk = kp // tk
    has_res = residual is not None

    if nk == 1:   # K fits in one block: no accumulator scratch, shorter epilogue
        grid = (mp // tm, np_ // tn)
        xmap = lambda i, j: (i, 0)
        wmap = lambda i, j: (0, j)
        bmap = lambda i, j: (0, j)
        omap = lambda i, j: (i, j)
        dim_sem = ("parallel", "parallel")
        scratch = []
    else:
        grid = (mp // tm, np_ // tn, nk)
        xmap = lambda i, j, k: (i, k)
        wmap = lambda i, j, k: (k, j)
        bmap = lambda i, j, k: (0, j)     # k-invariant: stays resident over K sweep
        omap = lambda i, j, k: (i, j)
        dim_sem = ("parallel", "parallel", "arbitrary")
        scratch = [pltpu.VMEM((tm, tn), jnp.float32)]

    in_specs = [pl.BlockSpec((tm, tk), xmap),
                pl.BlockSpec((tk, tn), wmap),
                pl.BlockSpec((1, tn), bmap)]
    args = [x, w, b2d]
    if has_res:
        in_specs.append(pl.BlockSpec((tm, tn), omap))
        args.append(residual)

    kernel = functools.partial(_linear_kernel, apply_relu=apply_relu,
                               has_residual=has_res, multi_k=(nk > 1))

    out = pl.pallas_call(
        kernel,
        grid=grid,
        in_specs=in_specs,
        out_specs=pl.BlockSpec((tm, tn), omap),
        out_shape=jax.ShapeDtypeStruct((mp, np_), out_dtype),
        scratch_shapes=scratch,
        compiler_params=pltpu.CompilerParams(
            dimension_semantics=dim_sem,
            vmem_limit_bytes=_vmem_limit_bytes(),
        ),
    )(*args)

    if mp != M or np_ != N:
        out = out[:M, :N]
    return out


# --------------------------------------------------------------------------------
# Layer-group planning: fuse maximal runs of adjacent layers whose resident
# weights + activation buffers fit a VMEM budget; oversized layers go tiled.
# --------------------------------------------------------------------------------
_FUSED_TM_CAP = 512


def _group_fits(wbs, tm, budget):
    wbytes = sum(2 * (w.size * w.dtype.itemsize + b.size * b.dtype.itemsize)
                 for w, b in wbs)
    dims = [wbs[0][0].shape[0]] + [w.shape[1] for w, _ in wbs]
    max_d = max(dims)
    abytes = 2 * tm * dims[0] * 4 + 2 * tm * dims[-1] * 4 + 4 * tm * max_d * 4
    return wbytes + abytes <= budget


def _plan_groups(prepped, budget, tm):
    groups, cur = [], []
    for idx in range(len(prepped)):
        trial = [prepped[k] for k in cur] + [prepped[idx]]
        if _group_fits(trial, tm, budget):
            cur.append(idx)
            continue
        if cur:
            groups.append(("fused", cur))
            cur = []
        if _group_fits([prepped[idx]], tm, budget):
            cur = [idx]
        else:
            groups.append(("tiled", [idx]))
    if cur:
        groups.append(("fused", cur))
    return groups


# --------------------------------------------------------------------------------
# Forward wrapper (matches MLP.forward with batch_norm=False, dropout=0).
# --------------------------------------------------------------------------------
def mlp_forward(x, prepped, short_cut=False):
    lead = x.shape[:-1]
    h = x.reshape(-1, x.shape[-1])
    n_layers = len(prepped)
    budget = _vmem_limit_bytes() // 2
    plan = _plan_groups(prepped, budget, _FUSED_TM_CAP)

    for kind, idxs in plan:
        is_final = idxs[-1] == n_layers - 1
        # hidden activations that hit HBM travel in bf16; final output keeps x.dtype
        out_dtype = x.dtype if is_final else jnp.bfloat16
        if kind == "fused":
            wbs = [prepped[k] for k in idxs]
            relu_flags = [k < n_layers - 1 for k in idxs]
            h = fused_mlp_group(h, wbs, relu_flags, short_cut, out_dtype,
                                tm_cap=_FUSED_TM_CAP)
        else:
            k = idxs[0]
            w, b = prepped[k]
            res = h if (short_cut and h.shape[1] == w.shape[1]) else None
            h = linear(h, w, b, apply_relu=(k < n_layers - 1),
                       residual=res, out_dtype=out_dtype)
    return h.reshape(*lead, h.shape[-1])


# --------------------------------------------------------------------------------
# Pure-JAX references.
# --------------------------------------------------------------------------------
def mlp_reference(x, params, short_cut=False, mxu_dtype=None):
    """mxu_dtype=None: exact PyTorch f32 semantics.
    mxu_dtype=bf16: mirrors the kernel's bf16-operand / f32-accumulate matmuls."""
    lead = x.shape[:-1]
    h = x.reshape(-1, x.shape[-1]).astype(jnp.float32)
    n_layers = len(params)
    for i, (w, b) in enumerate(params):
        if mxu_dtype is not None:
            hid = jnp.dot(h.astype(mxu_dtype), w.astype(mxu_dtype),
                          preferred_element_type=jnp.float32) + b
        else:
            hid = h @ w + b
        if i < n_layers - 1:
            hid = jnp.maximum(hid, 0.0)
        if short_cut and hid.shape == h.shape:
            hid = hid + h
        h = hid
    return h.reshape(*lead, h.shape[-1])


def make_params(key, dims):
    params = []
    for i in range(len(dims) - 1):
        key, kw, kb = jax.random.split(key, 3)
        w = jax.random.normal(kw, (dims[i], dims[i + 1]), dtype=jnp.float32) * 0.1
        b = jax.random.normal(kb, (dims[i + 1],), dtype=jnp.float32) * 0.01
        params.append((w, b))
    return params


if __name__ == "__main__":
    import numpy as np

    key = jax.random.PRNGKey(0)
    k_x, k_p1, k_p2 = jax.random.split(key, 3)

    # Config 1: MLP(input_dim=32, hidden_dims=[128, 64]); input (batch=2, seq=8, 32).
    dims = [32, 128, 64]
    x = jax.random.normal(k_x, (2, 8, 32), dtype=jnp.float32)
    params = make_params(k_p1, dims)
    prepped = prepare_params(params)

    out = jax.block_until_ready(mlp_forward(x, prepped))
    ref_mxu = mlp_reference(x, params, mxu_dtype=jnp.bfloat16)  # same precision path
    ref_f32 = mlp_reference(x, params)                          # PyTorch f32 semantics
    np.testing.assert_allclose(np.asarray(out), np.asarray(ref_mxu),
                               rtol=1e-4, atol=1e-4)
    np.testing.assert_allclose(np.asarray(out), np.asarray(ref_f32),
                               rtol=5e-2, atol=5e-2)

    # Config 2: MLP(32, [32, 32], short_cut=True) — fused residual path.
    dims_sc = [32, 32, 32]
    params_sc = make_params(k_p2, dims_sc)
    prepped_sc = prepare_params(params_sc)
    out_sc = jax.block_until_ready(mlp_forward(x, prepped_sc, short_cut=True))
    ref_sc = mlp_reference(x, params_sc, short_cut=True, mxu_dtype=jnp.bfloat16)
    np.testing.assert_allclose(np.asarray(out_sc), np.asarray(ref_sc),
                               rtol=1e-4, atol=1e-4)

    # Config 3: exercise the tiled K-reduction fallback directly (grid (2,1,2)).
    k_a, k_w, k_b = jax.random.split(k_p1, 3)
    xa = jax.random.normal(k_a, (16, 256), dtype=jnp.float32)
    wa = (jax.random.normal(k_w, (256, 128), dtype=jnp.float32) * 0.05
          ).astype(jnp.bfloat16)
    ba = jax.random.normal(k_b, (1, 128), dtype=jnp.float32) * 0.01
    out_a = jax.block_until_ready(
        linear(xa, wa, ba, apply_relu=True, tm_cap=8, tn_cap=128, tk_cap=128))
    ref_a = jnp.maximum(
        jnp.dot(xa.astype(jnp.bfloat16), wa,
                preferred_element_type=jnp.float32) + ba, 0.0)
    np.testing.assert_allclose(np.asarray(out_a), np.asarray(ref_a),
                               rtol=1e-4, atol=1e-4)

    print("KERNEL_OK")
</pallas_src>

<mosaic_0001>
module attributes {stable_mosaic.version = 11 : i64} {
  func.func @_fused_mlp_kernel(%arg0: i32, %arg1: memref<16x32xf32, #tpu.memory_space<vmem>>, %arg2: memref<32x128xbf16, #tpu.memory_space<vmem>>, %arg3: memref<1x128xf32, #tpu.memory_space<vmem>>, %arg4: memref<128x64xbf16, #tpu.memory_space<vmem>>, %arg5: memref<1x64xf32, #tpu.memory_space<vmem>>, %arg6: memref<16x64xf32, #tpu.memory_space<vmem>>) attributes {dimension_semantics = [#tpu.dimension_semantics<parallel>], iteration_bounds = array<i64: 1>, scalar_prefetch = 0 : i64, scratch_operands = 0 : i64, tpu.core_type = #tpu.core_type<tc>, window_params = [{transform_indices = @transform_0, window_bounds = array<i64: 16, 32>}, {pipeline_mode = #tpu.pipeline_mode<synchronous>, transform_indices = @transform_1, window_bounds = array<i64: 32, 128>}, {pipeline_mode = #tpu.pipeline_mode<synchronous>, transform_indices = @transform_2, window_bounds = array<i64: 1, 128>}, {pipeline_mode = #tpu.pipeline_mode<synchronous>, transform_indices = @transform_3, window_bounds = array<i64: 128, 64>}, {pipeline_mode = #tpu.pipeline_mode<synchronous>, transform_indices = @transform_4, window_bounds = array<i64: 1, 64>}, {transform_indices = @transform_5, window_bounds = array<i64: 16, 64>}]} {
    %c0 = arith.constant 0 : index
    %c0_0 = arith.constant 0 : index
    %0 = vector.load %arg1[%c0, %c0_0] : memref<16x32xf32, #tpu.memory_space<vmem>>, vector<16x32xf32>
    %c0_1 = arith.constant 0 : index
    %c0_2 = arith.constant 0 : index
    %1 = vector.load %arg2[%c0_1, %c0_2] : memref<32x128xbf16, #tpu.memory_space<vmem>>, vector<32x128xbf16>
    %c0_3 = arith.constant 0 : index
    %c0_4 = arith.constant 0 : index
    %2 = vector.load %arg3[%c0_3, %c0_4] : memref<1x128xf32, #tpu.memory_space<vmem>>, vector<1x128xf32>
    %3 = arith.truncf %0 : vector<16x32xf32> to vector<16x32xbf16>
    %cst = arith.constant dense<0.000000e+00> : vector<16x128xf32>
    %4 = tpu.matmul %3, %1, %cst {dimension_numbers = #tpu.dot_dimension_numbers<[1], [0], [0], [1], [0, 0, 1, 1], [], []>} : vector<16x32xbf16>, vector<32x128xbf16>, vector<16x128xf32> -> vector<16x128xf32>
    %5 = vector.broadcast %2 : vector<1x128xf32> to vector<16x128xf32>
    %6 = arith.addf %4, %5 : vector<16x128xf32>
    %cst_5 = arith.constant 0.000000e+00 : f32
    %7 = vector.broadcast %cst_5 : f32 to vector<16x128xf32>
    %8 = arith.maximumf %6, %7 : vector<16x128xf32>
    %c0_6 = arith.constant 0 : index
    %c0_7 = arith.constant 0 : index
    %9 = vector.load %arg4[%c0_6, %c0_7] : memref<128x64xbf16, #tpu.memory_space<vmem>>, vector<128x64xbf16>
    %c0_8 = arith.constant 0 : index
    %c0_9 = arith.constant 0 : index
    %10 = vector.load %arg5[%c0_8, %c0_9] : memref<1x64xf32, #tpu.memory_space<vmem>>, vector<1x64xf32>
    %11 = arith.truncf %8 : vector<16x128xf32> to vector<16x128xbf16>
    %cst_10 = arith.constant dense<0.000000e+00> : vector<16x64xf32>
    %12 = tpu.matmul %11, %9, %cst_10 {dimension_numbers = #tpu.dot_dimension_numbers<[1], [0], [0], [1], [0, 0, 1, 1], [], []>} : vector<16x128xbf16>, vector<128x64xbf16>, vector<16x64xf32> -> vector<16x64xf32>
    %13 = vector.broadcast %10 : vector<1x64xf32> to vector<16x64xf32>
    %14 = arith.addf %12, %13 : vector<16x64xf32>
    %c0_11 = arith.constant 0 : index
    %c0_12 = arith.constant 0 : index
    %15 = vector.load %arg6[%c0_11, %c0_12] : memref<16x64xf32, #tpu.memory_space<vmem>>, vector<16x64xf32>
    tpu.vector_store %arg6[%c0_11, %c0_12], %14 {strides = array<i32>} : memref<16x64xf32, #tpu.memory_space<vmem>>, vector<16x64xf32>,
    return
  }
  func.func @transform_0(%arg0: i32) -> (i32, i32) {
    %c0_i32 = arith.constant 0 : i32
    %c0_i32_0 = arith.constant 0 : i32
    return %arg0, %c0_i32 : i32, i32
  }
  func.func @transform_1(%arg0: i32) -> (i32, i32) {
    %c0_i32 = arith.constant 0 : i32
    %c0_i32_0 = arith.constant 0 : i32
    %c0_i32_1 = arith.constant 0 : i32
    return %c0_i32, %c0_i32_0 : i32, i32
  }
  func.func @transform_2(%arg0: i32) -> (i32, i32) {
    %c0_i32 = arith.constant 0 : i32
    %c0_i32_0 = arith.constant 0 : i32
    %c0_i32_1 = arith.constant 0 : i32
    return %c0_i32, %c0_i32_0 : i32, i32
  }
  func.func @transform_3(%arg0: i32) -> (i32, i32) {
    %c0_i32 = arith.constant 0 : i32
    %c0_i32_0 = arith.constant 0 : i32
    %c0_i32_1 = arith.constant 0 : i32
    return %c0_i32, %c0_i32_0 : i32, i32
  }
  func.func @transform_4(%arg0: i32) -> (i32, i32) {
    %c0_i32 = arith.constant 0 : i32
    %c0_i32_0 = arith.constant 0 : i32
    %c0_i32_1 = arith.constant 0 : i32
    return %c0_i32, %c0_i32_0 : i32, i32
  }
  func.func @transform_5(%arg0: i32) -> (i32, i32) {
    %c0_i32 = arith.constant 0 : i32
    %c0_i32_0 = arith.constant 0 : i32
    return %arg0, %c0_i32 : i32, i32
  }
}

</mosaic_0001>

<bundles_post_ra>
// kernel: tpu_custom_call.1
= control target key start
LH: loop header
LB: loop body
LE: loop exit
PB: predicated region body
PF: predicated region fallthrough
CT: control target
= control target key end

     0   :  { %s329_s0 = inlined_call_operand.vmem [shape: f32[16,32], index: 0, kind: input, shape index: {}]   ;;  %s330_s1 = inlined_call_operand.vmem [shape: bf16[32,128], index: 1, kind: input, shape index: {}]   ;;  %s331_s2 = inlined_call_operand.vmem [shape: f32[1,128], index: 2, kind: input, shape index: {}]   ;;  %s332_s3 = inlined_call_operand.vmem [shape: bf16[128,64], index: 3, kind: input, shape index: {}]   ;;  %s333_s4 = inlined_call_operand.vmem [shape: f32[1,64], index: 4, kind: input, shape index: {}]   ;;  %s334_s5 = inlined_call_operand.hbm [shape: f32[16,64], index: 5, kind: output, shape index: {}]  }
   0x1   :  { %v211_v0 = vld [vmem:[%s330_s1 + $0x8] sm:$0xff]  ;;  %v210_v1 = vld [vmem:[%s330_s1] sm:$0xff]  ;;  %v219_v2 = vld [vmem:[%s332_s3 + $0x38] sm:$0xff] }
   0x2   :  { %55 = vmatpush.bf16.msra.mxu0 %v211_v0  ;;  %v22_v3 = vld [vmem:[%s329_s0] sm:$0xff]  ;;  %v23_v4 = vld [vmem:[%s329_s0 + $0x8] sm:$0xff]  ;;  %134 = vmatpush.bf16.msra.mxu1 %v219_v2  ;;  %v218_v5 = vld [vmem:[%s332_s3 + $0x30] sm:$0xff] }
   0x3   :  { %10 = vsyncpa [#allocation3], 0  ;;  %v29_v6 = vpack.c.bf16 %v23_v4, %v22_v3  ;;  %vm45_vm0 = vcmask 261120   ;;  %v217_v7 = vld [vmem:[%s332_s3 + $0x28] sm:$0xff]  ;;  %v216_v8 = vld [vmem:[%s332_s3 + $0x20] sm:$0xff]  ;;  %vm148_vm1 = vcmask 523264  }
   0x4   :  { %v215_v9 = vld [vmem:[%s332_s3 + $0x18] sm:$0xff]  ;;  %v214_v10 = vld [vmem:[%s332_s3 + $0x10] sm:$0xff]  ;;  %v213_v11 = vld [vmem:[%s332_s3 + $0x8] sm:$0xff]  ;;  %s252_s22 = smov 128   ;;  %s253_s23 = smov 8  }
   0x5   :  { %v212_v12 = vld [vmem:[%s332_s3] sm:$0xff]  ;;  %s251_s3 = smov [#allocation2]  }
   0x6   :  { %56 = vmatpush.bf16.msra.mxu0 %v210_v1  ;;  %135 = vmatpush.bf16.msra.mxu1 %v218_v5  ;;  %v223_v14 = vld [vmem:[%s331_s2] ss:$0 sm:$0xff]  ;;  %s155_s19 = sshll.u32 %s251_s3, 4  ;;  %s157_s2 = sshll.u32 %s334_s5, 4  ;;  %s156_s19 = int_to_ptr.vmem [resolvable:$true] %s155_s19  ;;  %s158_s2 = int_to_ptr.hbm [resolvable:$true] %s157_s2 }
   0x7   :  { %v224_v21 = vld [vmem:[%s333_s4] ss:$0 sm:$0xff] }
   0x9   :  { %177 = vmatmul.msk.bf16.vlgmr.msra.gmra.mxu0 %vm45_vm0, %v29_v6 }
   0xa   :  { %136 = vmatpush.bf16.msra.mxu1 %v217_v7 }
   0xe   :  { %137 = vmatpush.bf16.msra.mxu1 %v216_v8 }
  0x12   :  { %138 = vmatpush.bf16.msra.mxu1 %v215_v9 }
  0x16   :  { %139 = vmatpush.bf16.msra.mxu1 %v214_v10 }
  0x1a   :  { %140 = vmatpush.bf16.msra.mxu1 %v213_v11 }
  0x1e   :  { %141 = vmatpush.bf16.msra.mxu1 %v212_v12 }
  0x86   :  { %v58_v13 = vpop.f32.mrf.mxu0 }
  0x87   :  { %v59_v15 = vadd.f32 %v223_v14, %v58_v13 }
  0x89   :  { %v63_v18 = vmax.f32 %v59_v15, 0.0 }
  0x8e   :  { %v60_v16 = vpop.f32.mrf.mxu0 }
  0x8f   :  { %v61_v17 = vadd.f32 %v223_v14, %v60_v16 }
  0x91   :  { %v64_v19 = vmax.f32 %v61_v17, 0.0 }
  0x93   :  { %v82_v20 = vpack.c.bf16 %v64_v19, %v63_v18 }
  0x95   :  { %142 = vmatmul.bf16.vlgmr.msra.gmra.mxu1 %v82_v20 }
 0x112   :  { %v143_v22 = vpop.f32.mrf.mxu1 }
 0x113   :  { %v144_v23 = vadd.f32 %v224_v21, %v143_v22 }
 0x115   :  { %149 = vst.msk [vmem:[#allocation2] sm:$0xff] %vm148_vm1, %v144_v23 }
 0x11a   :  { %v145_v24 = vpop.f32.mrf.mxu1 }
 0x11b   :  { %v146_v25 = vadd.f32 %v224_v21, %v145_v24 }
 0x11d   :  { %150 = vst.msk [vmem:[#allocation2 + $0x8] sm:$0xff] %vm148_vm1, %v146_v25 }
 0x11e   :  { %163 = dma.vmem_to_hbm [thread:$0]  %s156_s19, 256, %s158_s2, [#allocation3], %s252_s22, %s252_s22, %s253_s23  }
 0x11f   :  { %249 = dma.done.wait [#allocation3], 256  }
 0x120   :  { %250 = vsyncadd [#allocation3], 4294967040 }
 0x121   :  { %168 = vsyncpa [#allocation3], 1 }

</bundles_post_ra>
